<compile_context>
chip_gen: v7x
topology: tpu7x:2x2x1
jax: 0.10.0
libtpu: 0.0.40
codegen_flags: <defaults>
</compile_context>

<pallas_src>
import functools

import jax
import jax.numpy as jnp
from jax.experimental import pallas as pl
from jax.experimental.pallas import tpu as pltpu

LANE = 128
VMEM_LIMIT = 32 * 1024 * 1024  # safe on v5e/v6e/v7x; plenty for 128-wide tiles


def _round_up(v, m):
    return (v + m - 1) // m * m


def _pad2d(a, rows, cols):
    out = jnp.zeros((rows, cols), a.dtype)
    return out.at[: a.shape[0], : a.shape[1]].set(a)


# ----------------------------------------------------------------------------
# Phase 0: temp = relu(x @ W1 + b1), tiled over node rows.
# ----------------------------------------------------------------------------
def lin1_relu_kernel(x_ref, w1_ref, b1_ref, out_ref):
    t = jnp.dot(x_ref[...], w1_ref[...], preferred_element_type=jnp.float32)
    out_ref[...] = jnp.maximum(t + b1_ref[...], 0.0)


def _lin1_relu(x, w1, b1, *, tm):
    n_pad, f = x.shape
    d = w1.shape[1]
    return pl.pallas_call(
        lin1_relu_kernel,
        out_shape=jax.ShapeDtypeStruct((n_pad, d), jnp.float32),
        grid=(n_pad // tm,),
        in_specs=[
            pl.BlockSpec((tm, f), lambda i: (i, 0)),
            pl.BlockSpec((f, d), lambda i: (0, 0)),
            pl.BlockSpec((1, d), lambda i: (0, 0)),
        ],
        out_specs=pl.BlockSpec((tm, d), lambda i: (i, 0)),
        compiler_params=pltpu.CompilerParams(
            dimension_semantics=("parallel",),
            vmem_limit_bytes=VMEM_LIMIT,
        ),
    )(x, w1, b1)


# ----------------------------------------------------------------------------
# Phase 1: streamed  out = A @ rhs  (A in bf16 tiles, f32 VMEM accumulator).
# ----------------------------------------------------------------------------
def spmm_kernel(adj_ref, rhs_ref, out_ref, acc_ref):
    k = pl.program_id(1)

    @pl.when(k == 0)
    def _():
        acc_ref[...] = jnp.zeros_like(acc_ref)

    acc_ref[...] += jnp.dot(adj_ref[...], rhs_ref[...],
                            preferred_element_type=jnp.float32)

    @pl.when(k == pl.num_programs(1) - 1)
    def _():
        out_ref[...] = acc_ref[...]


def _graph_matmul(adj_bf, rhs_bf, *, tm, tk, d):
    n_pad = adj_bf.shape[0]
    return pl.pallas_call(
        spmm_kernel,
        out_shape=jax.ShapeDtypeStruct((n_pad, d), jnp.float32),
        grid=(n_pad // tm, n_pad // tk),
        in_specs=[
            pl.BlockSpec((tm, tk), lambda i, k: (i, k)),  # streamed adjacency tile
            pl.BlockSpec((tk, d), lambda i, k: (k, 0)),   # RHS k-tile (bf16)
        ],
        out_specs=pl.BlockSpec((tm, d), lambda i, k: (i, 0)),
        scratch_shapes=[pltpu.VMEM((tm, d), jnp.float32)],
        compiler_params=pltpu.CompilerParams(
            dimension_semantics=("parallel", "arbitrary"),
            vmem_limit_bytes=VMEM_LIMIT,
        ),
    )(adj_bf, rhs_bf)


# ----------------------------------------------------------------------------
# Phase 2: A2t = A @ At, with the final linear + log-softmax fused into the
# last reduction step (split-weight form of the 5-way concat).
# ----------------------------------------------------------------------------
def spmm_head_kernel(adj_ref, atk_ref, temp_ref, atrow_ref,
                     wa_ref, wb_ref, wc_ref, b2_ref, out_ref, acc_ref,
                     *, num_classes):
    k = pl.program_id(1)

    @pl.when(k == 0)
    def _():
        acc_ref[...] = jnp.zeros_like(acc_ref)

    acc_ref[...] += jnp.dot(adj_ref[...], atk_ref[...],
                            preferred_element_type=jnp.float32)

    @pl.when(k == pl.num_programs(1) - 1)
    def _():
        a2t = acc_ref[...]
        # TODO(synk): F.dropout(p=0.5) of the reference (training mode) is
        # implemented as identity (eval semantics).
        ans = (jnp.dot(temp_ref[...], wa_ref[...], preferred_element_type=jnp.float32)
               + jnp.dot(atrow_ref[...], wb_ref[...], preferred_element_type=jnp.float32)
               + jnp.dot(a2t, wc_ref[...], preferred_element_type=jnp.float32)
               + b2_ref[...])
        # Mask lane-padded (non-existent) classes before the softmax reduction.
        lane = jax.lax.broadcasted_iota(jnp.int32, ans.shape, 1)
        ans = jnp.where(lane < num_classes, ans, -1e30)
        m = jnp.max(ans, axis=1, keepdims=True)
        s = ans - m
        lse = jnp.log(jnp.sum(jnp.exp(s), axis=1, keepdims=True))
        out_ref[...] = s - lse


def _graph_matmul_head(adj_bf, at_bf, temp_f32, at_f32, wa, wb, wc, b2,
                       *, tm, tk, d, c_pad, num_classes):
    n_pad = adj_bf.shape[0]
    return pl.pallas_call(
        functools.partial(spmm_head_kernel, num_classes=num_classes),
        out_shape=jax.ShapeDtypeStruct((n_pad, c_pad), jnp.float32),
        grid=(n_pad // tm, n_pad // tk),
        in_specs=[
            pl.BlockSpec((tm, tk), lambda i, k: (i, k)),     # streamed adjacency tile
            pl.BlockSpec((tk, d), lambda i, k: (k, 0)),      # At k-tile (bf16)
            pl.BlockSpec((tm, d), lambda i, k: (i, 0)),      # temp row tile (f32, epilogue)
            pl.BlockSpec((tm, d), lambda i, k: (i, 0)),      # At row tile (f32, epilogue)
            pl.BlockSpec((d, c_pad), lambda i, k: (0, 0)),   # wa = W2[0:d] + W2[d:2d]
            pl.BlockSpec((d, c_pad), lambda i, k: (0, 0)),   # wb = W2[2d:3d] + W2[3d:4d]
            pl.BlockSpec((d, c_pad), lambda i, k: (0, 0)),   # wc = W2[4d:5d]
            pl.BlockSpec((1, c_pad), lambda i, k: (0, 0)),   # b2
        ],
        out_specs=pl.BlockSpec((tm, c_pad), lambda i, k: (i, 0)),
        scratch_shapes=[pltpu.VMEM((tm, d), jnp.float32)],
        compiler_params=pltpu.CompilerParams(
            dimension_semantics=("parallel", "arbitrary"),
            vmem_limit_bytes=VMEM_LIMIT,
        ),
    )(adj_bf, at_bf, temp_f32, at_f32, wa, wb, wc, b2)


# ----------------------------------------------------------------------------
# Full forward wrapper (padding, split-weight precompute, bf16 casts).
# ----------------------------------------------------------------------------
def hgcn_forward(adj, x, w1, b1, w2, b2, *, tm=128, tk=128):
    n, f = x.shape
    dim = w1.shape[1]
    c = w2.shape[1]
    assert w2.shape[0] == 5 * dim

    d_pad = _round_up(dim, LANE)      # lane-align hidden dim
    c_pad = _round_up(c, LANE)        # lane-dense output block
    n_pad = _round_up(n, max(tm, tk))

    # Padded inputs / parameters (zero-padding is semantics-preserving).
    x_p = _pad2d(x.astype(jnp.float32), n_pad, f)
    w1_p = _pad2d(w1, f, d_pad)
    b1_p = _pad2d(b1, 1, d_pad)

    # Fold the 5-way concat cat(temp, temp, At, At, A2t) into split weights,
    # precomputed once here (not re-sliced/re-added per grid step).
    wa = w2[0 * dim:1 * dim] + w2[1 * dim:2 * dim]   # multiplies temp (appears twice)
    wb = w2[2 * dim:3 * dim] + w2[3 * dim:4 * dim]   # multiplies At   (appears twice)
    wc = w2[4 * dim:5 * dim]                         # multiplies A @ At
    wa_p = _pad2d(wa, d_pad, c_pad)
    wb_p = _pad2d(wb, d_pad, c_pad)
    wc_p = _pad2d(wc, d_pad, c_pad)
    b2_p = _pad2d(b2, 1, c_pad)

    # Dense normalized adjacency streamed as bf16 (halves HBM bytes of the
    # dominant A-stream; f32 accumulation in the kernels).
    # TODO(synk): for truly sparse production graphs, replace with a
    # block-sparse SpMM using PrefetchScalarGridSpec over nonzero block ids.
    adj_bf = _pad2d(adj.astype(jnp.float32), n_pad, n_pad).astype(jnp.bfloat16)

    # Phase 0: temp = relu(x @ W1 + b1)
    temp = _lin1_relu(x_p, w1_p, b1_p, tm=tm)                       # [n_pad, d_pad] f32
    # Phase 1: At = A @ temp
    at = _graph_matmul(adj_bf, temp.astype(jnp.bfloat16),
                       tm=tm, tk=tk, d=d_pad)                       # [n_pad, d_pad] f32
    # Phase 2: A2t = A @ At, fused head + log-softmax
    out = _graph_matmul_head(adj_bf, at.astype(jnp.bfloat16), temp, at,
                             wa_p, wb_p, wc_p, b2_p,
                             tm=tm, tk=tk, d=d_pad, c_pad=c_pad, num_classes=c)
    return out[:n, :c]


# ----------------------------------------------------------------------------
# Glue (plain JAX): gcn_norm -> dense normalized adjacency with self-loops.
# ----------------------------------------------------------------------------
def gcn_norm_dense(edge_index, edge_weight, num_nodes):
    row, col = edge_index[0], edge_index[1]
    self_loops = jnp.arange(num_nodes, dtype=row.dtype)
    row = jnp.concatenate([row, self_loops])
    col = jnp.concatenate([col, self_loops])
    w = jnp.concatenate([edge_weight, jnp.ones((num_nodes,), jnp.float32)])

    a = jnp.zeros((num_nodes, num_nodes), jnp.float32).at[row, col].add(w)
    deg = a.sum(axis=0)  # degree over target (col) index, as in PyG gcn_norm
    dinv = jnp.where(deg > 0, 1.0 / jnp.sqrt(deg), 0.0)
    return dinv[:, None] * a * dinv[None, :]


# ----------------------------------------------------------------------------
# Main
# ----------------------------------------------------------------------------
if __name__ == "__main__":
    key = jax.random.PRNGKey(0)

    # Small synthetic problem: N nodes, F input features, DIM hidden, C classes.
    N, F, DIM, C, E = 256, 16, 32, 8, 1024

    k_x, k_ei, k_w1, k_b1, k_w2, k_b2 = jax.random.split(key, 6)

    x = jax.random.normal(k_x, (N, F), jnp.float32)
    edge_index = jax.random.randint(k_ei, (2, E), 0, N, dtype=jnp.int32)
    edge_weight = jnp.ones((E,), jnp.float32)

    # Parameters stored input-major (transposed vs torch's [out, in]).
    w1 = jax.random.normal(k_w1, (F, DIM), jnp.float32) * 0.1
    b1 = jax.random.normal(k_b1, (1, DIM), jnp.float32) * 0.1
    w2 = jax.random.normal(k_w2, (5 * DIM, C), jnp.float32) * 0.1
    b2 = jax.random.normal(k_b2, (1, C), jnp.float32) * 0.1

    adj = gcn_norm_dense(edge_index, edge_weight, N)

    out = hgcn_forward(adj, x, w1, b1, w2, b2, tm=128, tk=128)
    out = jax.block_until_ready(out)

    # Pure-JAX f32 reference.
    hp = jax.lax.Precision.HIGHEST
    temp_ref = jnp.maximum(jnp.dot(x, w1, precision=hp) + b1, 0.0)
    at_ref = jnp.dot(adj, temp_ref, precision=hp)
    a2t_ref = jnp.dot(adj, at_ref, precision=hp)
    feats = jnp.concatenate([temp_ref, temp_ref, at_ref, at_ref, a2t_ref], axis=1)
    ans_ref = jnp.dot(feats, w2, precision=hp) + b2
    ref = jax.nn.log_softmax(ans_ref, axis=1)

    assert out.shape == (N, C)
    assert bool(jnp.all(jnp.isfinite(out)))
    # rows of log_softmax must (log-)sum to ~0
    assert bool(jnp.allclose(jnp.sum(jnp.exp(out), axis=1), 1.0, atol=1e-4))
    max_err = float(jnp.max(jnp.abs(out - ref)))
    assert max_err < 0.1, f"max abs err vs reference: {max_err}"

    print("KERNEL_OK")
</pallas_src>

<mosaic_0001>
module attributes {stable_mosaic.version = 11 : i64} {
  func.func @lin1_relu_kernel(%arg0: i32, %arg1: memref<128x16xf32, #tpu.memory_space<vmem>>, %arg2: memref<16x128xf32, #tpu.memory_space<vmem>>, %arg3: memref<1x128xf32, #tpu.memory_space<vmem>>, %arg4: memref<128x128xf32, #tpu.memory_space<vmem>>) attributes {dimension_semantics = [#tpu.dimension_semantics<parallel>], iteration_bounds = array<i64: 2>, scalar_prefetch = 0 : i64, scratch_operands = 0 : i64, tpu.core_type = #tpu.core_type<tc>, window_params = [{transform_indices = @transform_0, window_bounds = array<i64: 128, 16>}, {pipeline_mode = #tpu.pipeline_mode<synchronous>, transform_indices = @transform_1, window_bounds = array<i64: 16, 128>}, {pipeline_mode = #tpu.pipeline_mode<synchronous>, transform_indices = @transform_2, window_bounds = array<i64: 1, 128>}, {transform_indices = @transform_3, window_bounds = array<i64: 128, 128>}]} {
    %c0 = arith.constant 0 : index
    %c0_0 = arith.constant 0 : index
    %0 = vector.load %arg1[%c0, %c0_0] : memref<128x16xf32, #tpu.memory_space<vmem>>, vector<128x16xf32>
    %c0_1 = arith.constant 0 : index
    %c0_2 = arith.constant 0 : index
    %1 = vector.load %arg2[%c0_1, %c0_2] : memref<16x128xf32, #tpu.memory_space<vmem>>, vector<16x128xf32>
    %cst = arith.constant dense<0.000000e+00> : vector<128x128xf32>
    %2 = tpu.matmul %0, %1, %cst {dimension_numbers = #tpu.dot_dimension_numbers<[1], [0], [0], [1], [0, 0, 1, 1], [], []>} : vector<128x16xf32>, vector<16x128xf32>, vector<128x128xf32> -> vector<128x128xf32>
    %c0_3 = arith.constant 0 : index
    %c0_4 = arith.constant 0 : index
    %3 = vector.load %arg3[%c0_3, %c0_4] : memref<1x128xf32, #tpu.memory_space<vmem>>, vector<1x128xf32>
    %4 = vector.broadcast %3 : vector<1x128xf32> to vector<128x128xf32>
    %5 = arith.addf %2, %4 : vector<128x128xf32>
    %cst_5 = arith.constant 0.000000e+00 : f32
    %6 = vector.broadcast %cst_5 : f32 to vector<128x128xf32>
    %7 = arith.maximumf %5, %6 : vector<128x128xf32>
    %c0_6 = arith.constant 0 : index
    %c0_7 = arith.constant 0 : index
    %8 = vector.load %arg4[%c0_6, %c0_7] : memref<128x128xf32, #tpu.memory_space<vmem>>, vector<128x128xf32>
    tpu.vector_store %arg4[%c0_6, %c0_7], %7 {strides = array<i32>} : memref<128x128xf32, #tpu.memory_space<vmem>>, vector<128x128xf32>,
    return
  }
  func.func @transform_0(%arg0: i32) -> (i32, i32) {
    %c0_i32 = arith.constant 0 : i32
    %c0_i32_0 = arith.constant 0 : i32
    return %arg0, %c0_i32 : i32, i32
  }
  func.func @transform_1(%arg0: i32) -> (i32, i32) {
    %c0_i32 = arith.constant 0 : i32
    %c0_i32_0 = arith.constant 0 : i32
    %c0_i32_1 = arith.constant 0 : i32
    return %c0_i32, %c0_i32_0 : i32, i32
  }
  func.func @transform_2(%arg0: i32) -> (i32, i32) {
    %c0_i32 = arith.constant 0 : i32
    %c0_i32_0 = arith.constant 0 : i32
    %c0_i32_1 = arith.constant 0 : i32
    return %c0_i32, %c0_i32_0 : i32, i32
  }
  func.func @transform_3(%arg0: i32) -> (i32, i32) {
    %c0_i32 = arith.constant 0 : i32
    %c0_i32_0 = arith.constant 0 : i32
    return %arg0, %c0_i32 : i32, i32
  }
}

</mosaic_0001>

<bundles_post_ra>
// kernel: tpu_custom_call.1
= control target key start
LH: loop header
LB: loop body
LE: loop exit
PB: predicated region body
PF: predicated region fallthrough
CT: control target
= control target key end

     0   :  { %8 = vsyncpa [#allocation3], 0  ;;  %s859_s0 = inlined_call_operand.vmem [shape: f32[256,16], index: 0, kind: input, shape index: {}]   ;;  %s860_s1 = inlined_call_operand.vmem [shape: f32[16,128], index: 1, kind: input, shape index: {}]   ;;  %s861_s2 = inlined_call_operand.vmem [shape: f32[1,128], index: 2, kind: input, shape index: {}]   ;;  %s862_s3 = inlined_call_operand.hbm [shape: f32[256,128], index: 3, kind: output, shape index: {}]  }
   0x1   :  { %10 = vsyncpa [#allocation3 + $0x1], 0  ;;  %s709_s12 = smov 0   ;;  %s711_s13 = smov 0  }
   0x2   :  { %s713_s14 = smov 0   ;;  %s715_s15 = smov 0  }
   0x3 LB: > { %s730_s16 = sadd.s32 4294967295, %s684_s15   ;;  %s499_s17 = sadd.s32 4294967294, %s684_s15   ;;  %s684_s15 = sphi %s715_s15, %s868_s15   ;;  %s680_s14 = sphi %s713_s14, %s867_s14   ;;  %s676_s13 = sphi %s711_s13, %s866_s13   ;;  %s672_s12 = sphi %s709_s12, %s865_s12  }
   0x4   : > { %s734_s18 = sadd.s32 1, %s684_s15   ;;  %s91_s19 = sadd.s32 1, %s680_s14 }
   0x5   : > { %s88_s20 = ssub.s32 %s684_s15, %s734_s18  ;;  %p101_p0 = scmp.ne.s32.totalorder %s680_s14, %s676_s13 }
   0x6   : > { %p89_p1 = scmp.eq.s32.totalorder %s88_s20, 0  ;;  %p102_p2 = scmp.eq.s32.totalorder %s730_s16, 1 }
   0x7   : > { %p107_p3 = scmp.ne.s32.totalorder %s676_s13, %s672_s12  ;;  %p108_p4 = scmp.eq.s32.totalorder %s499_s17, 1 }
   0x8   : > { %s745_s21 = scalar_select %p89_p1, %s680_s14, %s91_s19  }
   0x9   : > { %p747_p5 = por %p102_p2, %p101_p0  ;;  %p751_p6 = por %p108_p4, %p107_p3 }
   0xa   : > { %p502_p7 = scmp.ge.s32.totalorder %s684_s15, 1  ;;  %p141_p8 = scmp.lt.s32.totalorder %s684_s15, 3 }
   0xc   : > { %p142_p9 = pnand %p502_p7, %p141_p8 }
   0xd   : > { %v188_v0 = vld [vmem:[%s860_s1] sm:$0xff] (!%p142_p9)  ;;  %v189_v1 = vld [vmem:[%s860_s1 + $0x8] sm:$0xff] (!%p142_p9)  ;;  %s504_s28 = sshll.u32 (!%p142_p9), %s730_s16, 4  ;;  %vm197_vm0 = vcmask (!%p142_p9), 130048   ;;  %s162_s6 = sand.u32 (!%p142_p9), 1, %s676_s13  }
   0xe   : > { %145 = sbr.rel (%p142_p9) target bundleno = 271 (0x10f), region = 32  ;;  %v575_v2 = vpack.c.bf16 (!%p142_p9), %v189_v1, %v188_v0  ;;  %p166_p10 = scmp.lt.s32.totalorder (!%p142_p9), %s504_s28, 31  ;;  %v506_v19 = vld [vmem:[%s861_s2] ss:$0 sm:$0xff] (!%p142_p9) }
   0xf   : > { %s503_s9 = sshll.u32 (!%p142_p9), %s162_s6, 7  ;;  %s528_s11 = sshll.u32 (!%p142_p9), %s730_s16, 11 }
  0x10   : > { %576 = vmatprep.subr.bf16.mxu0 (!%p142_p9), %v575_v2  ;;  %579 = vmatprep.subr.bf16.mxu1 (!%p142_p9), %v575_v2  ;;  %s789_s10 = scalar_lea.vmem (!%p142_p9), [#allocation2], %s503_s9  ;;  %s808_s20 = scalar_lea.hbm (!%p142_p9), %s862_s3, %s528_s11 }
  0x11   : > { %578 = vmatpush3.bf16.msra.mxu0 (!%p142_p9), %v575_v2  ;;  %580 = vmatpush3.bf16.msra.mxu1 (!%p142_p9), %v575_v2  ;;  %s437_s17 = sshll.u32 (!%p142_p9), %s789_s10, 4  ;;  %s818_s24 = scalar_lea.sflag (!%p142_p9), [#allocation3], %s162_s6  ;;  %s810_s17 = int_to_ptr.vmem [resolvable:$true] %s437_s17 }
  0x12   : > { %s622_s25 = scalar_lea.vmem (!%p142_p9), %s810_s17, 2048  ;;  %s686_s26 = smov (!%p142_p9), [#allocation2]  }
  0x13   : > { %p623_p11 = scmp.ne.s32.totalorder (!%p142_p9), %s810_s17, %s622_s25  ;;  %s626_s27 = sshll.u32 (!%p142_p9), %s686_s26, 4  ;;  %s627_s27 = int_to_ptr.vmem [resolvable:$false] %s626_s27 }
  0x14   : > { %p629_p0 = scmp.lt.s32.totalorder (!%p142_p9), %s810_s17, %s627_s27 }
  0x15   : > { %s870_s28 = smov (!%p166_p10, %s504_s28), 31  ;;  %p624_p12 = pnand %p623_p11, %p747_p5 }
  0x16   : > { %s505_s29 = sshll.u32 %s870_s28, 3  ;;  %s628_s28 = scalar_lea.vmem %s627_s27, 4096 }
  0x17   : > { %s169_s5 = scalar_lea.vmem %s859_s0, %s505_s29  ;;  %p625_p13 = pneg %p624_p12 }
  0x18   : > { %v172_v3 = vld [vmem:[%s169_s5] sm:$0xff]  ;;  %v173_v5 = vld [vmem:[%s169_s5 + $0x8] sm:$0xff]  ;;  %v174_v7 = vld [vmem:[%s169_s5 + $0x10] sm:$0xff]  ;;  %p630_p1 = scmp.lt.s32.totalorder %s628_s28, %s622_s25 }
  0x19   : > { %v180_v4 = vld [vmem:[%s169_s5 + $0x40] sm:$0xff]  ;;  %551 = vmatprep.mubr.msk.f32.mxu0 %vm197_vm0, %v172_v3  ;;  %v181_v6 = vld [vmem:[%s169_s5 + $0x48] sm:$0xff]  ;;  %v182_v8 = vld [vmem:[%s169_s5 + $0x50] sm:$0xff] }
  0x1a   : > { %563 = vmatprep.mubr.msk.f32.mxu1 %vm197_vm0, %v180_v4  ;;  %552 = vmatmul.mubr.msk.f32.vlgmr.msra.gmra.mrb[0].mxu0 %vm197_vm0, %v173_v5  ;;  %v175_v9 = vld [vmem:[%s169_s5 + $0x18] sm:$0xff]  ;;  %v176_v11 = vld [vmem:[%s169_s5 + $0x20] sm:$0xff]  ;;  %v177_v13 = vld [vmem:[%s169_s5 + $0x28] sm:$0xff]  ;;  %p631_p2 = por %p630_p1, %p629_p0 }
  0x1b   : > { %564 = vmatmul.mubr.msk.f32.vlgmr.msra.gmra.mrb[0].mxu1 %vm197_vm0, %v181_v6  ;;  %554 = vmatprep.mubr.msk.f32.mxu0 %vm197_vm0, %v174_v7  ;;  %v183_v10 = vld [vmem:[%s169_s5 + $0x58] sm:$0xff]  ;;  %v184_v12 = vld [vmem:[%s169_s5 + $0x60] sm:$0xff]  ;;  %v185_v14 = vld [vmem:[%s169_s5 + $0x68] sm:$0xff] }
  0x1c   : > { %566 = vmatprep.mubr.msk.f32.mxu1 %vm197_vm0, %v182_v8  ;;  %v178_v15 = vld [vmem:[%s169_s5 + $0x30] sm:$0xff]  ;;  %v179_v17 = vld [vmem:[%s169_s5 + $0x38] sm:$0xff]  ;;  %p632_p3 = pnand %p631_p2, %p625_p13 }
  0x1d   : > { %v186_v16 = vld [vmem:[%s169_s5 + $0x70] sm:$0xff]  ;;  %v187_v18 = vld [vmem:[%s169_s5 + $0x78] sm:$0xff] }
  0x1e   : > { %555 = vmatmul.mubr.msk.f32.gmra.mrb[2].mxu0 %vm197_vm0, %v175_v9 }
  0x1f   : > { %567 = vmatmul.mubr.msk.f32.gmra.mrb[2].mxu1 %vm197_vm0, %v183_v10  ;;  %557 = vmatprep.mubr.msk.f32.mxu0 %vm197_vm0, %v176_v11 }
  0x20   : > { %569 = vmatprep.mubr.msk.f32.mxu1 %vm197_vm0, %v184_v12 }
  0x22   : > { %558 = vmatmul.mubr.msk.f32.gmra.mrb[4].mxu0 %vm197_vm0, %v177_v13 }
  0x23   : > { %570 = vmatmul.mubr.msk.f32.gmra.mrb[4].mxu1 %vm197_vm0, %v185_v14  ;;  %560 = vmatprep.mubr.msk.f32.mxu0 %vm197_vm0, %v178_v15 }
  0x24   : > { %572 = vmatprep.mubr.msk.f32.mxu1 %vm197_vm0, %v186_v16 }
  0x26   : > { %561 = vmatmul.mubr.msk.f32.gmra.mrb[6].mxu0 %vm197_vm0, %v179_v17 }
  0x27   : > { %573 = vmatmul.mubr.msk.f32.gmra.mrb[6].mxu1 %vm197_vm0, %v187_v18 }
  0xed   : > { %v553_v20 = vpop.f32.mrb[0].mxu0 }
  0xee   : > { %v565_v21 = vpop.f32.mrb[0].mxu1  ;;  %v318_v22 = vadd.f32 %v553_v20, %v506_v19  ;;  %v312_v24 = vpop.f32.mrb[1].mxu0 }
  0xef   : > { %v358_v23 = vadd.f32 %v565_v21, %v506_v19  ;;  %v352_v25 = vpop.f32.mrb[1].mxu1  ;;  %v313_v26 = vadd.f32 %v506_v19, %v312_v24 }
  0xf0   : > { %v353_v27 = vadd.f32 %v506_v19, %v352_v25  ;;  %v392_v28 = vmax.f32 %v318_v22, 0.0 }
  0xf1   : > { %v400_v29 = vmax.f32 %v358_v23, 0.0  ;;  %v391_v30 = vmax.f32 %v313_v26, 0.0  ;;  %v556_v32 = vpop.f32.mrb[2].mxu0 }
  0xf2   : > { %v399_v31 = vmax.f32 %v353_v27, 0.0  ;;  %v568_v33 = vpop.f32.mrb[2].mxu1  ;;  %408 = vst [vmem:[%s789_s10 + $0x8] sm:$0xff] %v392_v28  ;;  %v328_v34 = vadd.f32 %v556_v32, %v506_v19  ;;  %v322_v36 = vpop.f32.mrb[3].mxu0 }
  0xf3   : > { %416 = vst [vmem:[%s789_s10 + $0x48] sm:$0xff] %v400_v29  ;;  %v368_v35 = vadd.f32 %v568_v33, %v506_v19  ;;  %v362_v37 = vpop.f32.mrb[3].mxu1  ;;  %407 = vst [vmem:[%s789_s10] sm:$0xff] %v391_v30  ;;  %v323_v38 = vadd.f32 %v506_v19, %v322_v36 }
  0xf4   : > { %415 = vst [vmem:[%s789_s10 + $0x40] sm:$0xff] %v399_v31  ;;  %v363_v39 = vadd.f32 %v506_v19, %v362_v37  ;;  %v394_v40 = vmax.f32 %v328_v34, 0.0 }
  0xf5   : > { %v402_v41 = vmax.f32 %v368_v35, 0.0  ;;  %v393_v42 = vmax.f32 %v323_v38, 0.0  ;;  %v559_v44 = vpop.f32.mrb[4].mxu0 }
  0xf6   : > { %v401_v43 = vmax.f32 %v363_v39, 0.0  ;;  %v571_v45 = vpop.f32.mrb[4].mxu1  ;;  %410 = vst [vmem:[%s789_s10 + $0x18] sm:$0xff] %v394_v40  ;;  %v338_v46 = vadd.f32 %v559_v44, %v506_v19  ;;  %v332_v48 = vpop.f32.mrb[5].mxu0 }
  0xf7   : > { %418 = vst [vmem:[%s789_s10 + $0x58] sm:$0xff] %v402_v41  ;;  %v378_v47 = vadd.f32 %v571_v45, %v506_v19  ;;  %v372_v49 = vpop.f32.mrb[5].mxu1  ;;  %409 = vst [vmem:[%s789_s10 + $0x10] sm:$0xff] %v393_v42  ;;  %v333_v50 = vadd.f32 %v506_v19, %v332_v48 }
  0xf8   : > { %417 = vst [vmem:[%s789_s10 + $0x50] sm:$0xff] %v401_v43  ;;  %v373_v51 = vadd.f32 %v506_v19, %v372_v49  ;;  %v396_v52 = vmax.f32 %v338_v46, 0.0 }
  0xf9   : > { %v404_v53 = vmax.f32 %v378_v47, 0.0  ;;  %v395_v54 = vmax.f32 %v333_v50, 0.0  ;;  %v562_v56 = vpop.f32.mrb[6].mxu0 }
  0xfa   : > { %v403_v55 = vmax.f32 %v373_v51, 0.0  ;;  %v574_v57 = vpop.f32.mrb[6].mxu1  ;;  %412 = vst [vmem:[%s789_s10 + $0x28] sm:$0xff] %v396_v52  ;;  %v348_v58 = vadd.f32 %v562_v56, %v506_v19  ;;  %v342_v60 = vpop.f32.mrb[7].mxu0 }
  0xfb   : > { %420 = vst [vmem:[%s789_s10 + $0x68] sm:$0xff] %v404_v53  ;;  %v388_v59 = vadd.f32 %v574_v57, %v506_v19  ;;  %v382_v61 = vpop.f32.mrb[7].mxu1  ;;  %411 = vst [vmem:[%s789_s10 + $0x20] sm:$0xff] %v395_v54  ;;  %v343_v62 = vadd.f32 %v506_v19, %v342_v60 }
  0xfc   : > { %419 = vst [vmem:[%s789_s10 + $0x60] sm:$0xff] %v403_v55  ;;  %v383_v63 = vadd.f32 %v506_v19, %v382_v61  ;;  %v398_v0 = vmax.f32 %v348_v58, 0.0 }
  0xfd   : > { %v406_v1 = vmax.f32 %v388_v59, 0.0  ;;  %v397_v2 = vmax.f32 %v343_v62, 0.0 }
  0xfe   : > { %v405_v3 = vmax.f32 %v383_v63, 0.0  ;;  %414 = vst [vmem:[%s789_s10 + $0x38] sm:$0xff] %v398_v0 }
  0xff   : > { %422 = vst [vmem:[%s789_s10 + $0x78] sm:$0xff] %v406_v1  ;;  %413 = vst [vmem:[%s789_s10 + $0x30] sm:$0xff] %v397_v2 }
 0x100   : > { %421 = vst [vmem:[%s789_s10 + $0x70] sm:$0xff] %v405_v3 }
 0x101   : > { %635 = shalt.err (!%p632_p3)
}
 0x102   : > { %s636_s29 = scalar_lea.hbm %s808_s20, 2048  ;;  %s640_s5 = scalar_lea.hbm %s862_s3, 4096 }
 0x103   : > { %p637_p4 = scmp.ne.s32.totalorder %s808_s20, %s636_s29  ;;  %p641_p9 = scmp.lt.u32.totalorder %s808_s20, %s862_s3 }
 0x104   : > { %p642_p10 = scmp.lt.u32.totalorder %s640_s5, %s636_s29  ;;  %p644_p12 = scmp.lt.u32.totalorder %s636_s29, %s808_s20 }
 0x105   : > { %p638_p7 = pnand %p637_p4, %p747_p5 }
 0x106   : > { %p643_p11 = por %p642_p10, %p641_p9 }
 0x107   : > { %p639_p8 = pneg %p638_p7 }
 0x108   : > { %p645_p13 = por %p644_p12, %p643_p11 }
 0x10a   : > { %p646_p0 = pnand %p645_p13, %p639_p8 }
 0x10c   : > { %649 = shalt.err (!%p646_p0)
}
 0x10d   : > { %s687_s8 = smov 128   ;;  %s688_s9 = smov 8  }
 0x10e   : > { %581 = dma.vmem_to_hbm [thread:$0]  (%p747_p5), %s810_s17, 2048, %s808_s20, %s818_s24, %s687_s8, %s687_s8, %s688_s9  }
 0x10f PF: > { %p587_p1 = scmp.ge.s32.totalorder %s684_s15, 2  ;;  %s452_s10 = sand.u32 1, %s672_s12  }
 0x110   : > { %s453_s11 = scalar_lea.sflag [#allocation3], %s452_s10 }
 0x111   : > { %p584_p2 = pnand %p587_p1, %p751_p6 }
 0x113   : > { %667 = dma.done.wait (!%p584_p2), %s453_s11, 2048  }
 0x114   : > { %669 = vsyncadd (!%p584_p2), %s453_s11, 4294965248  ;;  %p13_p3 = scmp.ge.s32.totalorder %s734_s18, 4   ;;  %s865_s12 = smov %s676_s13 }
 0x115   : > { %s866_s13 = smov %s680_s14  ;;  %s867_s14 = smov %s745_s21 }
 0x116   : > { %s868_s15 = smov %s734_s18  ;;  %15 = sbr.rel (!%p13_p3) target bundleno = 3 (0x3), region = 67 }
 0x11d   :  { %458 = vsyncpa [#allocation3], 1 }
 0x11e   :  { %460 = vsyncpa [#allocation3 + $0x1], 1 }

</bundles_post_ra>
